<compile_context>
chip_gen: v5e
topology: v5e:2x2
jax: 0.10.0
libtpu: 0.0.40
codegen_flags: <defaults>
</compile_context>

<pallas_src>
import jax
import jax.numpy as jnp
from jax.experimental import pallas as pl
from jax.experimental.pallas import tpu as pltpu

# ImageNet normalization constants (the module's `denormalize` undoes
# Normalize(mean=[.485,.456,.406], std=[.229,.224,.225])).
_IMAGENET_MEAN = (0.485, 0.456, 0.406)
_IMAGENET_STD = (0.229, 0.224, 0.225)


def _denorm_u8_kernel(x_ref, o_ref):
    """Per-block (1, C, H_tile, W): o = uint8(wrap(trunc((x*std_c + mean_c) * 255))).

    C == 3 is static, so the channel loop unrolls at trace time; the per-channel
    scale/bias are compile-time scalar constants folded into the VPU ops (no
    SMEM reads, no broadcast_in_dim materialization).
    """
    for c in range(len(_IMAGENET_MEAN)):
        y = (x_ref[0, c] * _IMAGENET_STD[c] + _IMAGENET_MEAN[c]) * 255.0
        # numpy's `(float_img).astype(np.uint8)` truncates toward zero and wraps
        # modulo 256 (x86 behaviour of the original module); reproduce that
        # explicitly: f32 -> i32 truncation, mask low byte, cast to u8.
        o_ref[0, c] = (y.astype(jnp.int32) & 0xFF).astype(jnp.uint8)


def _pick_h_tile(H: int, target: int = 256) -> int:
    """Largest multiple-of-32 divisor of H that is <= target, else full H.

    32 satisfies both the f32 input (8-sublane) and the uint8 output
    (32-sublane) tiling constraints; a full-H block is always legal.
    """
    if H <= target:
        return H
    for t in range(target - target % 32, 0, -32):
        if H % t == 0:
            return t
    return H


def prepare_images_for_yolo(images: jax.Array) -> jax.Array:
    """Pallas equivalent of YOLOv11LTeacher._prepare_images_for_yolo.

    images: float32 NCHW, ImageNet-normalized.
    returns: uint8 NCHW, denormalized and scaled by 255 with wraparound cast.
             The CHW -> HWC permute of the original code is deferred to the
             host-side numpy/PIL conversion (a free view), avoiding an extra
             full HBM transpose pass on device.
    """
    B, C, H, W = images.shape
    assert C == len(_IMAGENET_MEAN), "expected 3-channel RGB input"
    images = images.astype(jnp.float32)

    h_tile = _pick_h_tile(H)
    grid = (B, H // h_tile)

    return pl.pallas_call(
        _denorm_u8_kernel,
        out_shape=jax.ShapeDtypeStruct((B, C, H, W), jnp.uint8),
        grid=grid,
        in_specs=[pl.BlockSpec((1, C, h_tile, W), lambda b, h: (b, 0, h, 0))],
        out_specs=pl.BlockSpec((1, C, h_tile, W), lambda b, h: (b, 0, h, 0)),
        compiler_params=pltpu.CompilerParams(
            dimension_semantics=("parallel", "parallel"),
        ),
    )(images)


def yolo_teacher_forward(inputs):
    """Mirror of YOLOv11LTeacher.forward.

    inputs: tuple (images, targets); targets are ignored (as in the module).
    Since the actual ultralytics YOLO inference cannot be reproduced without
    external weights, this follows the module's fallback path and returns the
    empty feature/box/score lists, plus the prepared (denormalized, 0-255,
    uint8) images computed by the Pallas kernel.
    """
    images, _ = inputs
    prepared = prepare_images_for_yolo(images)
    # TODO(synk): the downstream ultralytics YOLO inference and PIL image
    # construction have no Pallas equivalent (external pretrained model).
    return {
        "feature_maps": [],
        "boxes": [],
        "scores": [],
        # NCHW uint8; the per-image CHW->HWC permute happens for free when the
        # tensor is converted to numpy/PIL on the host for YOLO consumption.
        "prepared_images": prepared,
    }


if __name__ == "__main__":
    import numpy as np

    key = jax.random.PRNGKey(0)
    B, C, H, W = 2, 3, 16, 16
    # Deterministic "normalized" images (NCHW, float32), as the teacher expects.
    images = jax.random.normal(key, (B, C, H, W), dtype=jnp.float32)
    targets = None  # unused by the forward pass

    out = yolo_teacher_forward((images, targets))
    prepared = jax.block_until_ready(out["prepared_images"])
    assert prepared.shape == (B, C, H, W)
    assert prepared.dtype == jnp.uint8

    # Host-side HWC view (this is where the original module's permute happens,
    # on the way to numpy/PIL), compared against a pure-numpy reference of the
    # same math with explicit truncate+wrap uint8 semantics.
    prepared_hwc = np.transpose(np.asarray(prepared), (0, 2, 3, 1))
    mean = np.asarray(_IMAGENET_MEAN, np.float32).reshape(1, C, 1, 1)
    std = np.asarray(_IMAGENET_STD, np.float32).reshape(1, C, 1, 1)
    ref_f = (np.asarray(images) * std + mean) * 255.0
    ref_u8 = (np.trunc(ref_f).astype(np.int64) & 0xFF).astype(np.uint8)
    ref_u8 = np.transpose(ref_u8, (0, 2, 3, 1))

    # Wrap-aware comparison: allow +/-1 (mod 256) for f32 rounding differences
    # near integer boundaries between TPU and host arithmetic.
    diff = (prepared_hwc.astype(np.int16) - ref_u8.astype(np.int16)) % 256
    assert np.all((diff <= 1) | (diff >= 255)), "mismatch vs numpy reference"

    print("KERNEL_OK")
</pallas_src>

<mosaic_0001>
module attributes {stable_mosaic.version = 11 : i64} {
  func.func @_denorm_u8_kernel(%arg0: i32, %arg1: i32, %arg2: memref<1x3x16x16xf32, #tpu.memory_space<vmem>>, %arg3: memref<1x3x16x16xi8, #tpu.memory_space<vmem>>) attributes {dimension_semantics = [#tpu.dimension_semantics<parallel>, #tpu.dimension_semantics<parallel>], iteration_bounds = array<i64: 2, 1>, scalar_prefetch = 0 : i64, scratch_operands = 0 : i64, tpu.core_type = #tpu.core_type<tc>, window_params = [{transform_indices = @transform_0, window_bounds = array<i64: 1, 3, 16, 16>}, {transform_indices = @transform_1, window_bounds = array<i64: 1, 3, 16, 16>}]} {
    %c0 = arith.constant 0 : index
    %c0_0 = arith.constant 0 : index
    %c0_1 = arith.constant 0 : index
    %c0_2 = arith.constant 0 : index
    %0 = vector.load %arg2[%c0, %c0_0, %c0_1, %c0_2] : memref<1x3x16x16xf32, #tpu.memory_space<vmem>>, vector<1x1x16x16xf32>
    %1 = vector.shape_cast %0 : vector<1x1x16x16xf32> to vector<16x16xf32>
    %cst = arith.constant 2.290000e-01 : f32
    %2 = vector.broadcast %cst : f32 to vector<16x16xf32>
    %3 = arith.mulf %1, %2 : vector<16x16xf32>
    %cst_3 = arith.constant 4.850000e-01 : f32
    %4 = vector.broadcast %cst_3 : f32 to vector<16x16xf32>
    %5 = arith.addf %3, %4 : vector<16x16xf32>
    %cst_4 = arith.constant 2.550000e+02 : f32
    %6 = vector.broadcast %cst_4 : f32 to vector<16x16xf32>
    %7 = arith.mulf %5, %6 : vector<16x16xf32>
    %8 = arith.fptosi %7 : vector<16x16xf32> to vector<16x16xi32>
    %c255_i32 = arith.constant 255 : i32
    %9 = vector.broadcast %c255_i32 : i32 to vector<16x16xi32>
    %10 = arith.andi %8, %9 : vector<16x16xi32>
    %11 = arith.trunci %10 : vector<16x16xi32> to vector<16x16xi8>
    %c0_5 = arith.constant 0 : index
    %c0_6 = arith.constant 0 : index
    %c0_7 = arith.constant 0 : index
    %c0_8 = arith.constant 0 : index
    %12 = vector.load %arg3[%c0_5, %c0_6, %c0_7, %c0_8] : memref<1x3x16x16xi8, #tpu.memory_space<vmem>>, vector<1x1x16x16xi8>
    %13 = vector.shape_cast %12 : vector<1x1x16x16xi8> to vector<16x16xi8>
    %14 = vector.shape_cast %11 : vector<16x16xi8> to vector<1x1x16x16xi8>
    tpu.vector_store %arg3[%c0_5, %c0_6, %c0_7, %c0_8], %14 {strides = array<i32>} : memref<1x3x16x16xi8, #tpu.memory_space<vmem>>, vector<1x1x16x16xi8>,
    %c0_9 = arith.constant 0 : index
    %c1 = arith.constant 1 : index
    %c0_10 = arith.constant 0 : index
    %c0_11 = arith.constant 0 : index
    %15 = vector.load %arg2[%c0_9, %c1, %c0_10, %c0_11] : memref<1x3x16x16xf32, #tpu.memory_space<vmem>>, vector<1x1x16x16xf32>
    %16 = vector.shape_cast %15 : vector<1x1x16x16xf32> to vector<16x16xf32>
    %cst_12 = arith.constant 2.240000e-01 : f32
    %17 = vector.broadcast %cst_12 : f32 to vector<16x16xf32>
    %18 = arith.mulf %16, %17 : vector<16x16xf32>
    %cst_13 = arith.constant 4.560000e-01 : f32
    %19 = vector.broadcast %cst_13 : f32 to vector<16x16xf32>
    %20 = arith.addf %18, %19 : vector<16x16xf32>
    %cst_14 = arith.constant 2.550000e+02 : f32
    %21 = vector.broadcast %cst_14 : f32 to vector<16x16xf32>
    %22 = arith.mulf %20, %21 : vector<16x16xf32>
    %23 = arith.fptosi %22 : vector<16x16xf32> to vector<16x16xi32>
    %c255_i32_15 = arith.constant 255 : i32
    %24 = vector.broadcast %c255_i32_15 : i32 to vector<16x16xi32>
    %25 = arith.andi %23, %24 : vector<16x16xi32>
    %26 = arith.trunci %25 : vector<16x16xi32> to vector<16x16xi8>
    %c0_16 = arith.constant 0 : index
    %c1_17 = arith.constant 1 : index
    %c0_18 = arith.constant 0 : index
    %c0_19 = arith.constant 0 : index
    %27 = vector.load %arg3[%c0_16, %c1_17, %c0_18, %c0_19] : memref<1x3x16x16xi8, #tpu.memory_space<vmem>>, vector<1x1x16x16xi8>
    %28 = vector.shape_cast %27 : vector<1x1x16x16xi8> to vector<16x16xi8>
    %29 = vector.shape_cast %26 : vector<16x16xi8> to vector<1x1x16x16xi8>
    tpu.vector_store %arg3[%c0_16, %c1_17, %c0_18, %c0_19], %29 {strides = array<i32>} : memref<1x3x16x16xi8, #tpu.memory_space<vmem>>, vector<1x1x16x16xi8>,
    %c0_20 = arith.constant 0 : index
    %c2 = arith.constant 2 : index
    %c0_21 = arith.constant 0 : index
    %c0_22 = arith.constant 0 : index
    %30 = vector.load %arg2[%c0_20, %c2, %c0_21, %c0_22] : memref<1x3x16x16xf32, #tpu.memory_space<vmem>>, vector<1x1x16x16xf32>
    %31 = vector.shape_cast %30 : vector<1x1x16x16xf32> to vector<16x16xf32>
    %cst_23 = arith.constant 2.250000e-01 : f32
    %32 = vector.broadcast %cst_23 : f32 to vector<16x16xf32>
    %33 = arith.mulf %31, %32 : vector<16x16xf32>
    %cst_24 = arith.constant 4.060000e-01 : f32
    %34 = vector.broadcast %cst_24 : f32 to vector<16x16xf32>
    %35 = arith.addf %33, %34 : vector<16x16xf32>
    %cst_25 = arith.constant 2.550000e+02 : f32
    %36 = vector.broadcast %cst_25 : f32 to vector<16x16xf32>
    %37 = arith.mulf %35, %36 : vector<16x16xf32>
    %38 = arith.fptosi %37 : vector<16x16xf32> to vector<16x16xi32>
    %c255_i32_26 = arith.constant 255 : i32
    %39 = vector.broadcast %c255_i32_26 : i32 to vector<16x16xi32>
    %40 = arith.andi %38, %39 : vector<16x16xi32>
    %41 = arith.trunci %40 : vector<16x16xi32> to vector<16x16xi8>
    %c0_27 = arith.constant 0 : index
    %c2_28 = arith.constant 2 : index
    %c0_29 = arith.constant 0 : index
    %c0_30 = arith.constant 0 : index
    %42 = vector.load %arg3[%c0_27, %c2_28, %c0_29, %c0_30] : memref<1x3x16x16xi8, #tpu.memory_space<vmem>>, vector<1x1x16x16xi8>
    %43 = vector.shape_cast %42 : vector<1x1x16x16xi8> to vector<16x16xi8>
    %44 = vector.shape_cast %41 : vector<16x16xi8> to vector<1x1x16x16xi8>
    tpu.vector_store %arg3[%c0_27, %c2_28, %c0_29, %c0_30], %44 {strides = array<i32>} : memref<1x3x16x16xi8, #tpu.memory_space<vmem>>, vector<1x1x16x16xi8>,
    return
  }
  func.func @transform_0(%arg0: i32, %arg1: i32) -> (i32, i32, i32, i32) {
    %c0_i32 = arith.constant 0 : i32
    %c0_i32_0 = arith.constant 0 : i32
    %c0_i32_1 = arith.constant 0 : i32
    return %arg0, %c0_i32, %arg1, %c0_i32_0 : i32, i32, i32, i32
  }
  func.func @transform_1(%arg0: i32, %arg1: i32) -> (i32, i32, i32, i32) {
    %c0_i32 = arith.constant 0 : i32
    %c0_i32_0 = arith.constant 0 : i32
    %c0_i32_1 = arith.constant 0 : i32
    return %arg0, %c0_i32, %arg1, %c0_i32_0 : i32, i32, i32, i32
  }
}

</mosaic_0001>

<bundles_post_ra>
// kernel: tpu_custom_call.1
= control target key start
LH: loop header
LB: loop body
LE: loop exit
PB: predicated region body
PF: predicated region fallthrough
CT: control target
= control target key end

     0   :  { %6 = vsyncpa [#allocation3], 0  ;;  %s694_s0 = inlined_call_operand.hbm [shape: f32[2,3,16,16], index: 0, kind: input, shape index: {}]   ;;  %s695_s1 = inlined_call_operand.hbm [shape: u8[2,3,16,16], index: 1, kind: output, shape index: {}]  }
   0x1   :  { %8 = vsyncpa [#allocation3 + $0x1], 0 }
   0x2   :  { %9 = vsyncpa [#allocation4], 0 }
   0x3   :  { %11 = vsyncpa [#allocation4 + $0x1], 0  ;;  %s567_s6 = smov 0   ;;  %s569_s7 = smov 0  }
   0x4   :  { %s571_s8 = smov 0   ;;  %s573_s9 = smov 0  }
   0x5   :  { %s575_s10 = smov 0   ;;  %s577_s11 = smov 0  }
   0x6 LB: > { %s321_s12 = sadd.s32 4294967295, %s551_s11   ;;  %s322_s13 = sadd.s32 4294967294, %s551_s11   ;;  %s551_s11 = sphi %s577_s11, %s17_s11   ;;  %s547_s10 = sphi %s575_s10, %s704_s10   ;;  %s543_s9 = sphi %s573_s9, %s703_s9   ;;  %s539_s8 = sphi %s571_s8, %s702_s8   ;;  %s535_s7 = sphi %s569_s7, %s701_s7   ;;  %s531_s6 = sphi %s567_s6, %s700_s6  }
   0x7   : > { %s29_s14 = sadd.s32 1, %s547_s10  ;;  %s38_s15 = sadd.s32 1, %s539_s8 }
   0x8   : > { %p31_p0 = scmp.ge.s32.totalorder %s29_s14, 2  ;;  %p45_p1 = scmp.ne.s32.totalorder %s539_s8, %s535_s7 }
   0x9   : > { %p46_p2 = scmp.eq.s32.totalorder %s551_s11, 0  ;;  %p51_p3 = scmp.ne.s32.totalorder %s535_s7, %s531_s6 }
   0xa   : > { %s706_s14 = smov (%p31_p0, %s29_s14), 0  ;;  %p52_p5 = scmp.eq.s32.totalorder %s321_s12, 0 }
   0xb   : > { %p608_p4 = por %p46_p2, %p45_p1  ;;  %s33_s17 = ssub.s32 %s547_s10, %s706_s14 }
   0xc   : > { %p77_p6 = scmp.eq.s32.totalorder %s321_s12, 1  ;;  %p36_p7 = scmp.eq.s32.totalorder %s33_s17, 0 }
   0xd   : > { %p614_p8 = por %p52_p5, %p51_p3  ;;  %p83_p10 = scmp.eq.s32.totalorder %s322_s13, 1 }
   0xe   : > { %p618_p9 = por %p77_p6, %p45_p1  ;;  %p324_p12 = scmp.ge.s32.totalorder %s551_s11, 2 }
   0xf   : > { %s623_s20 = scalar_select %p36_p7, %s539_s8, %s38_s15  }
  0x10   : > { %p625_p11 = por %p83_p10, %p51_p3  ;;  %p385_p13 = scmp.lt.s32.totalorder %s551_s11, 2 }
  0x11   : > { %s103_s22 = sand.u32 1, %s539_s8   ;;  %s339_s24 = smul.u32 48, %s547_s10 }
  0x12   : > { %s338_s23 = smul.u32 48, %s103_s22  ;;  %p378_p0 = pnand %p385_p13, %p608_p4 }
  0x13   : > { %s114_s27 = scalar_lea.hbm %s694_s0, %s339_s24  ;;  %p326_p1 = scmp.ge.s32.totalorder %s551_s11, 1 }
  0x14   : > { %s107_s28 = scalar_lea.vmem [#allocation2], %s338_s23  ;;  %s115_s30 = sshll.u32 %s114_s27, 4  ;;  %s116_s30 = int_to_ptr.hbm [resolvable:$true] %s115_s30 }
  0x15   : > { %s117_s29 = sshll.u32 %s107_s28, 4  ;;  %s104_s2 = scalar_lea.sflag [#allocation3], %s103_s22  ;;  %s118_s29 = int_to_ptr.vmem [resolvable:$true] %s117_s29 }
  0x16   : > { %s553_s3 = smov 128   ;;  %s554_s4 = smov 8  }
  0x17   : > { %380 = dma.hbm_to_vmem [thread:$0]  (!%p378_p0), %s116_s30, 768, %s118_s29, %s104_s2, %s553_s3, %s553_s3, %s554_s4  }
  0x18   : > { %p125_p2 = scmp.lt.s32.totalorder %s551_s11, 3 }
  0x1a   : > { %p126_p3 = pnand %p326_p1, %p125_p2 }
  0x1b   : > { %s641_s5 = sand.u32 (!%p126_p3), 1, %s535_s7  }
  0x1c   : > { %129 = sbr.rel (%p126_p3) target bundleno = 64 (0x40), region = 24  ;;  %s132_s13 = scalar_lea.sflag (!%p126_p3), [#allocation3], %s641_s5 }
  0x1d   : > { %s340_s12 = smul.u32 (!%p126_p3), 48, %s641_s5 }
  0x1f   : > { %s135_s15 = scalar_lea.vmem (!%p126_p3), [#allocation2], %s340_s12 }
  0x21   : > { %522 = dma.done.wait (%p614_p8), %s132_s13, 768  }
  0x22   : > { %524 = vsyncadd (%p614_p8), %s132_s13, 4294966528  ;;  %v157_v0 = vld [vmem:[%s135_s15] sm:$0xff]  ;;  %v158_v1 = vld [vmem:[%s135_s15 + $0x8] sm:$0xff]  ;;  %vm173_vm3 = vcmask 123904   ;;  %s341_s16 = smul.u32 12, %s641_s5  ;;  %s217_s26 = scalar_lea.sflag [#allocation4], %s641_s5 }
  0x23   : > { %v327_v2 = vld [vmem:[%s135_s15 + $0x10] sm:$0xff]  ;;  %v159_v3 = vmul.f32 0.229, %v157_v0  ;;  %v160_v4 = vmul.f32 0.229, %v158_v1  ;;  %v328_v6 = vld [vmem:[%s135_s15 + $0x18] sm:$0xff] }
  0x24   : > { %v179_v5 = vmul.f32 0.224, %v327_v2  ;;  %v331_v7 = vld [vmem:[%s135_s15 + $0x20] sm:$0xff]  ;;  %v332_v8 = vld [vmem:[%s135_s15 + $0x28] sm:$0xff]  ;;  %v180_v12 = vmul.f32 0.224, %v328_v6 }
  0x25   : > { %v161_v9 = vadd.f32 0.485, %v159_v3  ;;  %v162_v10 = vadd.f32 0.485, %v160_v4  ;;  %v199_v13 = vmul.f32 0.225, %v331_v7 }
  0x26   : > { %v181_v11 = vadd.f32 0.456, %v179_v5  ;;  %v200_v14 = vmul.f32 0.225, %v332_v8  ;;  %v182_v18 = vadd.f32 0.456, %v180_v12 }
  0x27   : > { %v163_v15 = vmul.f32 255.0, %v161_v9  ;;  %v164_v16 = vmul.f32 255.0, %v162_v10  ;;  %v201_v19 = vadd.f32 0.406, %v199_v13  ;;  %s372_s17 = smul.u32 12, %s543_s9  ;;  %s154_s18 = scalar_lea.vmem [#allocation5], %s341_s16 }
  0x28   : > { %v183_v17 = vmul.f32 255.0, %v181_v11  ;;  %v202_v20 = vadd.f32 0.406, %v200_v14  ;;  %v184_v28 = vmul.f32 255.0, %v182_v18  ;;  %s231_s24 = sshll.u32 %s154_s18, 4  ;;  %s489_s2 = scalar_lea.hbm %s695_s1, 24  ;;  %s232_s24 = int_to_ptr.vmem [resolvable:$true] %s231_s24 }
  0x29   : > { %vm342_vm0 = vcmp.lt.s32.totalorder %v163_v15, 0  ;;  %v343_v21 = vceil.f32 %v163_v15  ;;  %v344_v22 = vfloor.f32 %v163_v15  ;;  %vm347_vm1 = vcmp.lt.s32.totalorder %v164_v16, 0  ;;  %s230_s9 = scalar_lea.hbm %s695_s1, %s372_s17 }
  0x2a   : > { %v348_v23 = vceil.f32 %v164_v16  ;;  %v349_v24 = vfloor.f32 %v164_v16  ;;  %vm352_vm2 = vcmp.lt.s32.totalorder %v183_v17, 0  ;;  %v353_v25 = vceil.f32 %v183_v17  ;;  %s233_s25 = sshll.u32 %s230_s9, 4  ;;  %s234_s25 = int_to_ptr.hbm [resolvable:$true] %s233_s25 }
  0x2b   : > { %v345_v26 = vsel %vm342_vm0, %v343_v21, %v344_v22  ;;  %v354_v27 = vfloor.f32 %v183_v17  ;;  %v203_v29 = vmul.f32 255.0, %v201_v19  ;;  %v204_v32 = vmul.f32 255.0, %v202_v20  ;;  %s483_s27 = sshra.s32 %s234_s25, 4  ;;  %s484_s27 = int_to_ptr.hbm [resolvable:$true] %s483_s27 }
  0x2c   : > { %v346_v30 = vcvt.f32.s32 %v345_v26  ;;  %v350_v31 = vsel %vm347_vm1, %v348_v23, %v349_v24  ;;  %vm357_vm4 = vcmp.lt.s32.totalorder %v184_v28, 0  ;;  %v358_v35 = vceil.f32 %v184_v28  ;;  %s485_s28 = scalar_lea.hbm %s484_s27, 12  ;;  %p490_p7 = scmp.lt.s32.totalorder %s484_s27, %s695_s1 }
  0x2d   : > { %v351_v33 = vcvt.f32.s32 %v350_v31  ;;  %v355_v34 = vsel %vm352_vm2, %v353_v25, %v354_v27  ;;  %v359_v38 = vfloor.f32 %v184_v28  ;;  %vm362_vm5 = vcmp.lt.s32.totalorder %v203_v29, 0  ;;  %p486_p4 = scmp.ne.s32.totalorder %s484_s27, %s485_s28  ;;  %p491_p8 = scmp.lt.s32.totalorder %s489_s2, %s485_s28 }
  0x2e   : > { %v167_v36 = vand.u32 255, %v346_v30  ;;  %v356_v37 = vcvt.f32.s32 %v355_v34  ;;  %v363_v40 = vceil.f32 %v203_v29  ;;  %v364_v41 = vfloor.f32 %v203_v29 }
  0x2f   : > { %v168_v39 = vand.u32 255, %v351_v33  ;;  %vm367_vm6 = vcmp.lt.s32.totalorder %v204_v32, 0  ;;  %v360_v44 = vsel %vm357_vm4, %v358_v35, %v359_v38  ;;  %v368_v45 = vceil.f32 %v204_v32  ;;  %p487_p5 = pnand %p486_p4, %p618_p9  ;;  %p492_p10 = por %p491_p8, %p490_p7 }
  0x30   : > { %v169_v42 = vpack.c.b16 %v167_v36, %v167_v36  ;;  %v187_v43 = vand.u32 255, %v356_v37  ;;  %v361_v47 = vcvt.f32.s32 %v360_v44  ;;  %v365_v48 = vsel %vm362_vm5, %v363_v40, %v364_v41 }
  0x31   : > { %v171_v46 = vpack.c.b16 %v168_v39, %v168_v39  ;;  %v369_v49 = vfloor.f32 %v204_v32  ;;  %v366_v52 = vcvt.f32.s32 %v365_v48  ;;  %p488_p6 = pneg %p487_p5 }
  0x32   : > { %v170_v50 = vpack.c.b8 %v169_v42, %v169_v42  ;;  %v189_v51 = vpack.c.b16 %v187_v43, %v187_v43  ;;  %v188_v54 = vand.u32 255, %v361_v47 }
  0x33   : > { %v172_v53 = vpack.c.b8 %v171_v46, %v171_v46  ;;  %v370_v55 = vsel %vm367_vm6, %v368_v45, %v369_v49  ;;  %v207_v57 = vand.u32 255, %v366_v52  ;;  %p493_p13 = pnand %p492_p10, %p488_p6 }
  0x34   : > { %174 = vst.msk [vmem:[%s154_s18] sm:$0x3] %vm173_vm3, %v170_v50  ;;  %v190_v56 = vpack.c.b8 %v189_v51, %v189_v51  ;;  %v371_v58 = vcvt.f32.s32 %v370_v55  ;;  %v191_v59 = vpack.c.b16 %v188_v54, %v188_v54 }
  0x35   : > { %175 = vst.msk [vmem:[%s154_s18 + $0x2] sm:$0x3] %vm173_vm3, %v172_v53  ;;  %v209_v60 = vpack.c.b16 %v207_v57, %v207_v57 }
  0x36   : > { %329 = vst.msk [vmem:[%s154_s18 + $0x4] sm:$0x3] %vm173_vm3, %v190_v56  ;;  %v208_v61 = vand.u32 255, %v371_v58  ;;  %v192_v62 = vpack.c.b8 %v191_v59, %v191_v59 }
  0x37   : > { %v210_v63 = vpack.c.b8 %v209_v60, %v209_v60 }
  0x38   : > { %v211_v0 = vpack.c.b16 %v208_v61, %v208_v61  ;;  %330 = vst.msk [vmem:[%s154_s18 + $0x6] sm:$0x3] %vm173_vm3, %v192_v62 }
  0x39   : > { %333 = vst.msk [vmem:[%s154_s18 + $0x8] sm:$0x3] %vm173_vm3, %v210_v63 }
  0x3a   : > { %v212_v1 = vpack.c.b8 %v211_v0, %v211_v0 }
  0x3c   : > { %334 = vst.msk [vmem:[%s154_s18 + $0xa] sm:$0x3] %vm173_vm3, %v212_v1 }
  0x3d   : > { %496 = shalt.err (!%p493_p13)
}
  0x3e   : > { %s555_s5 = smov 32   ;;  %s556_s12 = smov 2  }
  0x3f   : > { %375 = dma.vmem_to_hbm [thread:$0]  (%p618_p9), %s232_s24, 192, %s234_s25, %s217_s26, %s555_s5, %s555_s5, %s556_s12  }
  0x40 PF: > { %s248_s13 = sand.u32 1, %s531_s6   ;;  %p382_p0 = pnand %p324_p12, %p625_p11 }
  0x41   : > { %s249_s15 = scalar_lea.sflag [#allocation4], %s248_s13 }
  0x42   : > { %p383_p1 = pneg %p382_p0 }
  0x44   : > { %526 = dma.done.wait (%p383_p1), %s249_s15, 192  }
  0x45   : > { %528 = vsyncadd (%p383_p1), %s249_s15, 4294967104  ;;  %s17_s11 = sadd.s32 1, %s551_s11   ;;  %s700_s6 = smov %s535_s7 }
  0x46   : > { %p14_p2 = scmp.ge.s32.totalorder %s17_s11, 4   ;;  %s701_s7 = smov %s539_s8 }
  0x47   : > { %s702_s8 = smov %s623_s20  ;;  %s703_s9 = smov %s547_s10 }
  0x48   : > { %s704_s10 = smov %s706_s14  ;;  %16 = sbr.rel (!%p14_p2) target bundleno = 6 (0x6), region = 73 }
  0x4d   :  { %255 = vsyncpa [#allocation3], 1 }
  0x4e   :  { %257 = vsyncpa [#allocation3 + $0x1], 1 }
  0x4f   :  { %258 = vsyncpa [#allocation4], 1 }
  0x50   :  { %260 = vsyncpa [#allocation4 + $0x1], 1 }

</bundles_post_ra>
